<compile_context>
chip_gen: v5e
topology: v5e:2x2
jax: 0.10.0
libtpu: 0.0.40
codegen_flags: <defaults>
</compile_context>

<pallas_src>
import functools

import jax
import jax.numpy as jnp
from jax.experimental import pallas as pl
from jax.experimental.pallas import tpu as pltpu


def _target_cost_kernel(theta_ref, omega_ref, o_ref, *, half_reg_speed):
    # theta_ref / omega_ref / o_ref blocks: (TR, 128) f32
    theta = theta_ref[...]
    omega = omega_ref[...]
    c = 1.0 + jnp.cos(theta)
    # 0.5 * (1 + cos(theta))^2 + (0.5 * reg_speed) * omega^2
    o_ref[...] = 0.5 * c * c + half_reg_speed * omega * omega


def _pick_tile_rows(R, cap=1024):
    """Largest multiple-of-8 divisor of R not exceeding `cap` (>= 8 rows)."""
    cap = min(R, cap)
    best = 8
    for t in range(8, cap + 1, 8):
        if R % t == 0:
            best = t
    return best


def inverse_pendulum_target_cost(x, reg_speed, *, tile_rows=None):
    """x: (2, R, 128) float32, R % 8 == 0.  Returns (R, 128) float32."""
    assert x.ndim == 3 and x.shape[0] == 2
    _, R, L = x.shape
    assert R % 8 == 0 and L == 128

    if tile_rows is None:
        tile_rows = _pick_tile_rows(R)
    assert R % tile_rows == 0 and tile_rows % 8 == 0

    # Contiguous per-component inputs (clean full-bandwidth DMAs per tile).
    theta = x[0]
    omega = x[1]

    kernel = functools.partial(
        _target_cost_kernel, half_reg_speed=0.5 * float(reg_speed)
    )

    # 3 blocks (theta, omega, out) double-buffered, plus headroom.
    block_bytes = tile_rows * L * 4
    vmem_limit = min(128 << 20, max(16 << 20, 4 * 3 * block_bytes + (2 << 20)))

    return pl.pallas_call(
        kernel,
        out_shape=jax.ShapeDtypeStruct((R, L), jnp.float32),
        grid_spec=pltpu.PrefetchScalarGridSpec(
            num_scalar_prefetch=0,
            grid=(R // tile_rows,),
            in_specs=[
                pl.BlockSpec((tile_rows, L), lambda i: (i, 0)),
                pl.BlockSpec((tile_rows, L), lambda i: (i, 0)),
            ],
            out_specs=pl.BlockSpec((tile_rows, L), lambda i: (i, 0)),
        ),
        compiler_params=pltpu.CompilerParams(
            dimension_semantics=("parallel",),
            vmem_limit_bytes=int(vmem_limit),
        ),
    )(theta, omega)


def _reference(x, reg_speed):
    theta, omega = x[0], x[1]
    return 0.5 * (1.0 + jnp.cos(theta)) ** 2 + 0.5 * reg_speed * omega ** 2


if __name__ == "__main__":
    reg_speed = 0.1  # module __init__ arg (deterministic, set in-script)

    key = jax.random.PRNGKey(0)
    # Small state batch: (2, 16, 128) -> angle / speed over 16*128 states.
    # (At this size the auto tile picker uses a single full-array block.)
    x = jax.random.normal(key, (2, 16, 128), dtype=jnp.float32)

    out = inverse_pendulum_target_cost(x, reg_speed)
    out = jax.block_until_ready(out)

    ref = _reference(x, reg_speed)
    assert out.shape == ref.shape == (16, 128)
    assert jnp.allclose(out, ref, atol=1e-5, rtol=1e-5)

    print("KERNEL_OK")
</pallas_src>

<mosaic_0001>
module attributes {stable_mosaic.version = 11 : i64} {
  func.func @_target_cost_kernel(%arg0: i32, %arg1: memref<16x128xf32, #tpu.memory_space<vmem>>, %arg2: memref<16x128xf32, #tpu.memory_space<vmem>>, %arg3: memref<16x128xf32, #tpu.memory_space<vmem>>) attributes {dimension_semantics = [#tpu.dimension_semantics<parallel>], iteration_bounds = array<i64: 1>, scalar_prefetch = 0 : i64, scratch_operands = 0 : i64, tpu.core_type = #tpu.core_type<tc>, window_params = [{transform_indices = @transform_0, window_bounds = array<i64: 16, 128>}, {transform_indices = @transform_1, window_bounds = array<i64: 16, 128>}, {transform_indices = @transform_2, window_bounds = array<i64: 16, 128>}]} {
    %c0 = arith.constant 0 : index
    %c0_0 = arith.constant 0 : index
    %0 = vector.load %arg1[%c0, %c0_0] : memref<16x128xf32, #tpu.memory_space<vmem>>, vector<16x128xf32>
    %c0_1 = arith.constant 0 : index
    %c0_2 = arith.constant 0 : index
    %1 = vector.load %arg2[%c0_1, %c0_2] : memref<16x128xf32, #tpu.memory_space<vmem>>, vector<16x128xf32>
    %2 = math.cos %0 : vector<16x128xf32>
    %cst = arith.constant 1.000000e+00 : f32
    %3 = vector.broadcast %cst : f32 to vector<16x128xf32>
    %4 = arith.addf %3, %2 : vector<16x128xf32>
    %cst_3 = arith.constant 5.000000e-01 : f32
    %5 = vector.broadcast %cst_3 : f32 to vector<16x128xf32>
    %6 = arith.mulf %5, %4 : vector<16x128xf32>
    %7 = arith.mulf %6, %4 : vector<16x128xf32>
    %cst_4 = arith.constant 5.000000e-02 : f32
    %8 = vector.broadcast %cst_4 : f32 to vector<16x128xf32>
    %9 = arith.mulf %8, %1 : vector<16x128xf32>
    %10 = arith.mulf %9, %1 : vector<16x128xf32>
    %11 = arith.addf %7, %10 : vector<16x128xf32>
    %c0_5 = arith.constant 0 : index
    %c0_6 = arith.constant 0 : index
    %12 = vector.load %arg3[%c0_5, %c0_6] : memref<16x128xf32, #tpu.memory_space<vmem>>, vector<16x128xf32>
    tpu.vector_store %arg3[%c0_5, %c0_6], %11 {strides = array<i32>} : memref<16x128xf32, #tpu.memory_space<vmem>>, vector<16x128xf32>,
    return
  }
  func.func @transform_0(%arg0: i32) -> (i32, i32) {
    %c0_i32 = arith.constant 0 : i32
    %c0_i32_0 = arith.constant 0 : i32
    return %arg0, %c0_i32 : i32, i32
  }
  func.func @transform_1(%arg0: i32) -> (i32, i32) {
    %c0_i32 = arith.constant 0 : i32
    %c0_i32_0 = arith.constant 0 : i32
    return %arg0, %c0_i32 : i32, i32
  }
  func.func @transform_2(%arg0: i32) -> (i32, i32) {
    %c0_i32 = arith.constant 0 : i32
    %c0_i32_0 = arith.constant 0 : i32
    return %arg0, %c0_i32 : i32, i32
  }
}

</mosaic_0001>

<bundles_post_ra>
// kernel: tpu_custom_call.1
= control target key start
LH: loop header
LB: loop body
LE: loop exit
PB: predicated region body
PF: predicated region fallthrough
CT: control target
= control target key end

     0   :  { %7 = vsyncpa [#allocation3], 0  ;;  %s712_s0 = inlined_call_operand.hbm [shape: f32[16,128], index: 0, kind: input, shape index: {}]   ;;  %s713_s1 = inlined_call_operand.hbm [shape: f32[16,128], index: 1, kind: input, shape index: {}]   ;;  %s714_s2 = inlined_call_operand.hbm [shape: f32[16,128], index: 2, kind: output, shape index: {}]  }
   0x1   :  { %8 = vsyncpa [#allocation6], 0 }
   0x2   :  { %9 = vsyncpa [#allocation4], 0  ;;  %s14_s11 = sshll.u32 %s712_s0, 4  ;;  %s486_s12 = smov [#allocation2]   ;;  %s15_s11 = int_to_ptr.hbm [resolvable:$true] %s14_s11 }
   0x3   :  { %s16_s13 = sshll.u32 %s486_s12, 4  ;;  %s27_s16 = sshll.u32 %s713_s1, 4  ;;  %s17_s13 = int_to_ptr.vmem [resolvable:$true] %s16_s13  ;;  %s28_s16 = int_to_ptr.hbm [resolvable:$true] %s27_s16 }
   0x4   :  { %s487_s17 = smov 128   ;;  %s488_s18 = smov 8  }
   0x5   :  { %22 = dma.hbm_to_vmem [thread:$0]  %s15_s11, 256, %s17_s13, [#allocation3], %s487_s17, %s487_s17, %s488_s18  }
   0x6   :  { %s489_s19 = smov [#allocation5]  }
   0x7   :  { %s29_s20 = sshll.u32 %s489_s19, 4  ;;  %s30_s20 = int_to_ptr.vmem [resolvable:$true] %s29_s20 }
   0x8   :  { %35 = dma.hbm_to_vmem [thread:$0]  %s28_s16, 256, %s30_s20, [#allocation6], %s487_s17, %s487_s17, %s488_s18  }
   0x9   :  { %480 = dma.done.wait [#allocation3], 256  }
   0xa   :  { %481 = vsyncadd [#allocation3], 4294967040 }
   0xb   :  { %482 = dma.done.wait [#allocation6], 256  }
   0xc   :  { %483 = vsyncadd [#allocation6], 4294967040  ;;  %v525_v0 = vld [vmem:[#allocation2] sm:$0xff]  ;;  %v527_v1 = vld [vmem:[#allocation2 + $0x8] sm:$0xff]  ;;  %v490_v23 = vmov 683565275  }
   0xd   :  { %v48_v2 = vand.u32 2147483647, %v525_v0  ;;  %v51_v3 = vand.u32 2139095040, %v525_v0  ;;  %v205_v4 = vand.u32 2139095040, %v527_v1  ;;  %v202_v5 = vand.u32 2147483647, %v527_v1 }
   0xe   :  { %v491_v25 = vmov 2475754826   ;;  %v492_v27 = vmov 2131351028   ;;  %v493_v29 = vmov 2102212464  }
   0xf   :  { %v52_v6 = vshrl.u32 %v51_v3, 23  ;;  %v55_v7 = vand.u32 8388607, %v48_v2  ;;  %v206_v8 = vshrl.u32 %v205_v4, 23  ;;  %v209_v12 = vand.u32 8388607, %v202_v5 }
  0x10   :  { %v494_v31 = vmov 920167782   ;;  %v495_v40 = vmov 1326507024   ;;  %s497_s0 = smov [#allocation7]   ;;  %s376_s23 = sshll.u32 %s714_s2, 4  ;;  %s377_s23 = int_to_ptr.hbm [resolvable:$true] %s376_s23 }
  0x11   :  { %v390_v9 = vadd.s32 4294967169, %v52_v6  ;;  %v393_v10 = vadd.s32 4294967169, %v206_v8  ;;  %v56_v11 = vor.u32 8388608, %v55_v7  ;;  %v210_v17 = vor.u32 8388608, %v209_v12  ;;  %s374_s1 = sshll.u32 %s497_s0, 4  ;;  %s375_s1 = int_to_ptr.vmem [resolvable:$true] %s374_s1 }
  0x13   :  { %v58_v13 = vadd.s32 1, %v390_v9  ;;  %v212_v14 = vadd.s32 1, %v393_v10  ;;  %v537_v16 = vshll.u32 %v56_v11, 8  ;;  %v547_v34 = vshll.u32 %v210_v17, 8 }
  0x15   :  { %vm59_vm0 = vcmp.gt.s32.totalorder %v58_v13, 0  ;;  %vm213_vm1 = vcmp.gt.s32.totalorder %v212_v14, 0  ;;  %v97_v33 = vand.u32 65535, %v537_v16  ;;  %v98_v38 = vshrl.u32 %v537_v16, 16 }
  0x16   :  { %v60_v15 = vsel %vm59_vm0, %v58_v13, 0  ;;  %v214_v18 = vsel %vm213_vm1, %v212_v14, 0 }
  0x17   :  { %v62_v19 = vand.u32 31, %v60_v15  ;;  %v539_v20 = vshrl.u32 %v60_v15, 5  ;;  %v541_v21 = vand.u32 31, %v214_v18  ;;  %v565_v51 = vshrl.u32 %v214_v18, 5 }
  0x19   :  { %v63_v22 = vsub.s32 32, %v62_v19  ;;  %v65_v24 = vshll.u32 %v490_v23, %v62_v19  ;;  %v68_v26 = vshll.u32 %v491_v25, %v62_v19  ;;  %v71_v28 = vshll.u32 %v492_v27, %v62_v19 }
  0x1a   :  { %v74_v30 = vshll.u32 %v493_v29, %v62_v19  ;;  %v77_v32 = vshll.u32 %v494_v31, %v62_v19  ;;  %vm80_vm2 = vcmp.lt.s32.totalorder %v539_v20, 1  ;;  %vm83_vm3 = vcmp.lt.s32.totalorder %v539_v20, 4 }
  0x1b   :  { %v66_v35 = vshrl.u32 %v491_v25, %v63_v22  ;;  %v69_v36 = vshrl.u32 %v492_v27, %v63_v22  ;;  %v72_v37 = vshrl.u32 %v493_v29, %v63_v22  ;;  %v75_v39 = vshrl.u32 %v494_v31, %v63_v22 }
  0x1c   :  { %v78_v41 = vshrl.u32 %v495_v40, %v63_v22  ;;  %v556_v45 = vsub.s32 32, %v541_v21  ;;  %v64_v46 = vshrl.u32 %v490_v23, %v63_v22  ;;  %vm82_vm4 = vcmp.lt.s32.totalorder %v539_v20, 3 }
  0x1d   :  { %v67_v42 = vor.u32 %v66_v35, %v65_v24  ;;  %v70_v43 = vor.u32 %v69_v36, %v68_v26  ;;  %v73_v44 = vor.u32 %v72_v37, %v71_v28  ;;  %v76_v47 = vor.u32 %v75_v39, %v74_v30 }
  0x1e   :  { %v79_v48 = vor.u32 %v78_v41, %v77_v32  ;;  %vm81_vm5 = vcmp.lt.s32.totalorder %v539_v20, 2  ;;  %v219_v54 = vshll.u32 %v490_v23, %v541_v21  ;;  %v222_v55 = vshll.u32 %v491_v25, %v541_v21 }
  0x1f   :  { %v88_v49 = vsel %vm80_vm2, %v67_v42, %v70_v43  ;;  %v92_v50 = vsel %vm80_vm2, %v70_v43, %v73_v44  ;;  %v89_v52 = vsel %vm83_vm3, %v76_v47, 920167782  ;;  %v85_v56 = vsel %vm83_vm3, %v73_v44, 2102212464 }
  0x20   :  { %v93_v53 = vsel %vm83_vm3, %v79_v48, 1326507024  ;;  %v90_v57 = vsel %vm82_vm4, %v73_v44, %v89_v52  ;;  %v220_v59 = vshrl.u32 %v491_v25, %v556_v45  ;;  %v84_v60 = vsel %vm80_vm2, %v64_v46, %v67_v42 }
  0x21   :  { %v94_v58 = vsel %vm82_vm4, %v76_v47, %v93_v53  ;;  %v91_v61 = vsel %vm81_vm5, %v88_v49, %v90_v57  ;;  %v223_v63 = vshrl.u32 %v492_v27, %v556_v45  ;;  %v86_v8 = vsel %vm82_vm4, %v70_v43, %v85_v56 }
  0x22   :  { %v95_v62 = vsel %vm81_vm5, %v92_v50, %v94_v58  ;;  %v121_v6 = vand.u32 65535, %v91_v61  ;;  %v122_v7 = vshrl.u32 %v91_v61, 16  ;;  %v590_v9 = vor.u32 %v220_v59, %v219_v54 }
  0x23   :  { %v99_v3 = vand.u32 65535, %v95_v62  ;;  %v100_v4 = vshrl.u32 %v95_v62, 16  ;;  %v592_v10 = vor.u32 %v223_v63, %v222_v55  ;;  %v225_v11 = vshll.u32 %v492_v27, %v541_v21 }
  0x24   :  { %v226_v15 = vshrl.u32 %v493_v29, %v556_v45  ;;  %v123_v18 = vmul.u32 %v121_v6, %v97_v33  ;;  %v124_v19 = vmul.u32 %v122_v7, %v97_v33  ;;  %v125_v22 = vmul.u32 %v121_v6, %v98_v38 }
  0x25   :  { %v101_v12 = vmul.u32 %v99_v3, %v97_v33  ;;  %v102_v13 = vmul.u32 %v100_v4, %v97_v33  ;;  %v103_v14 = vmul.u32 %v99_v3, %v98_v38  ;;  %v104_v17 = vmul.u32 %v100_v4, %v98_v38 }
  0x26   :  { %v126_v28 = vmul.u32 %v122_v7, %v98_v38  ;;  %v127_v32 = vshll.u32 %v124_v19, 16  ;;  %v128_v35 = vshrl.u32 %v124_v19, 16  ;;  %v129_v36 = vshll.u32 %v125_v22, 16 }
  0x27   :  { %v105_v24 = vshll.u32 %v102_v13, 16  ;;  %v106_v25 = vshrl.u32 %v102_v13, 16  ;;  %v107_v26 = vshll.u32 %v103_v14, 16  ;;  %v108_v30 = vshrl.u32 %v103_v14, 16 }
  0x28   :  { %v130_v37 = vshrl.u32 %v125_v22, 16  ;;  %v228_v39 = vshll.u32 %v493_v29, %v541_v21  ;;  %v496_v41 = vmov 0   ;;  %vm131_vm7 = vc.u32 %v123_v18, %v127_v32 }
  0x29   :  { %vm109_vm6 = vc.u32 %v101_v12, %v105_v24  ;;  %v111_v27 = vadd.s32 %v105_v24, %v101_v12  ;;  %v133_v33 = vadd.s32 %v127_v32, %v123_v18  ;;  %v229_v43 = vshrl.u32 %v494_v31, %v556_v45 }
  0x2a   :  { %v110_v42 = vsel %vm109_vm6, 1, %v496_v41  ;;  %v132_v38 = vsel %vm131_vm7, 1, %v496_v41  ;;  %v231_v46 = vshll.u32 %v494_v31, %v541_v21  ;;  %v227_v29 = vor.u32 %v226_v15, %v225_v11 }
  0x2b   :  { %v112_v44 = vadd.s32 %v110_v42, %v104_v17  ;;  %vm113_vm8 = vc.u32 %v111_v27, %v107_v26  ;;  %v134_v48 = vadd.s32 %v132_v38, %v126_v28  ;;  %vm135_vm9 = vc.u32 %v133_v33, %v129_v36 }
  0x2c   :  { %v114_v47 = vsel %vm113_vm8, 1, %v496_v41  ;;  %v136_v50 = vsel %vm135_vm9, 1, %v496_v41  ;;  %v230_v52 = vor.u32 %v229_v43, %v228_v39  ;;  %v232_v53 = vshrl.u32 %v495_v40, %v556_v45 }
  0x2d   :  { %v116_v49 = vadd.s32 %v114_v47, %v112_v44  ;;  %v609_v54 = vadd.s32 %v133_v33, %v129_v36  ;;  %v138_v55 = vadd.s32 %v136_v50, %v134_v48  ;;  %vm234_vm10 = vcmp.lt.s32.totalorder %v565_v51, 1 }
  0x2e   :  { %vm236_vm11 = vcmp.lt.s32.totalorder %v565_v51, 3  ;;  %v233_v31 = vor.u32 %v232_v53, %v231_v46  ;;  %vm235_vm12 = vcmp.lt.s32.totalorder %v565_v51, 2  ;;  %vm237_vm13 = vcmp.lt.s32.totalorder %v565_v51, 4 }
  0x2f   :  { %v117_v21 = vadd.s32 %v116_v49, %v106_v25  ;;  %v87_v56 = vsel %vm81_vm5, %v84_v60, %v86_v8  ;;  %v139_v57 = vadd.s32 %v138_v55, %v128_v35  ;;  %v242_v40 = vsel %vm234_vm10, %v590_v9, %v592_v10 }
  0x30   :  { %v243_v58 = vsel %vm237_vm13, %v230_v52, 920167782  ;;  %v246_v62 = vsel %vm234_vm10, %v592_v10, %v227_v29  ;;  %v251_v20 = vand.u32 65535, %v547_v34  ;;  %v247_v3 = vsel %vm237_vm13, %v233_v31, 1326507024 }
  0x31   :  { %v623_v59 = vadd.s32 %v117_v21, %v108_v30  ;;  %v244_v61 = vsel %vm236_vm11, %v227_v29, %v243_v58  ;;  %v140_v60 = vadd.s32 %v139_v57, %v130_v37  ;;  %v252_v4 = vshrl.u32 %v547_v34, 16 }
  0x32   :  { %v245_v63 = vsel %vm235_vm12, %v242_v40, %v244_v61  ;;  %v141_v6 = vmul.u32 %v537_v16, %v87_v56  ;;  %v248_v7 = vsel %vm236_vm11, %v230_v52, %v247_v3  ;;  %v218_v18 = vshrl.u32 %v490_v23, %v556_v45 }
  0x33   :  { %vm143_vm14 = vc.u32 %v623_v59, %v609_v54  ;;  %v275_v8 = vand.u32 65535, %v245_v63  ;;  %v144_v11 = vadd.s32 1, %v140_v60  ;;  %v249_v12 = vsel %vm235_vm12, %v246_v62, %v248_v7 }
  0x34   :  { %v276_v13 = vshrl.u32 %v245_v63, 16  ;;  %v253_v14 = vand.u32 65535, %v249_v12  ;;  %v254_v15 = vshrl.u32 %v249_v12, 16  ;;  %v239_v35 = vsel %vm237_vm13, %v227_v29, 2102212464 }
  0x35   :  { %v145_v17 = vsel %vm143_vm14, %v144_v11, %v140_v60  ;;  %v279_v16 = vmul.u32 %v275_v8, %v252_v4  ;;  %v277_v26 = vmul.u32 %v275_v8, %v251_v20  ;;  %v238_v37 = vsel %vm234_vm10, %v218_v18, %v590_v9 }
  0x36   :  { %v278_v19 = vmul.u32 %v276_v13, %v251_v20  ;;  %v146_v22 = vadd.s32 %v145_v17, %v141_v6  ;;  %v255_v24 = vmul.u32 %v253_v14, %v251_v20  ;;  %v256_v25 = vmul.u32 %v254_v15, %v251_v20 }
  0x37   :  { %v257_v28 = vmul.u32 %v253_v14, %v252_v4  ;;  %v258_v36 = vmul.u32 %v254_v15, %v252_v4  ;;  %v280_v23 = vmul.u32 %v276_v13, %v252_v4  ;;  %v283_v45 = vshll.u32 %v279_v16, 16 }
  0x38   :  { %v281_v30 = vshll.u32 %v278_v19, 16  ;;  %v147_v32 = vadd.s32 536870912, %v146_v22  ;;  %v259_v27 = vshll.u32 %v256_v25, 16  ;;  %v240_v43 = vsel %vm236_vm11, %v592_v10, %v239_v35 }
  0x39   :  { %v261_v39 = vshll.u32 %v257_v28, 16  ;;  %v260_v9 = vshrl.u32 %v256_v25, 16  ;;  %v282_v49 = vshrl.u32 %v278_v19, 16  ;;  %v262_v53 = vshrl.u32 %v257_v28, 16 }
  0x3a   :  { %v650_v42 = vshrl.u32 %v147_v32, 30  ;;  %vm263_vm15 = vc.u32 %v255_v24, %v259_v27  ;;  %v265_v33 = vadd.s32 %v259_v27, %v255_v24  ;;  %vm285_vm0 = vc.u32 %v277_v26, %v281_v30 }
  0x3b   :  { %v264_v44 = vsel %vm263_vm15, 1, %v496_v41  ;;  %v286_v38 = vsel %vm285_vm0, 1, %v496_v41  ;;  %v287_v46 = vadd.s32 %v281_v30, %v277_v26  ;;  %v284_v21 = vshrl.u32 %v279_v16, 16 }
  0x3c   :  { %v149_v47 = vshll.u32 %v650_v42, 30  ;;  %v266_v48 = vadd.s32 %v264_v44, %v258_v36  ;;  %vm267_vm1 = vc.u32 %v265_v33, %v261_v39  ;;  %v288_v50 = vadd.s32 %v286_v38, %v280_v23 }
  0x3d   :  { %v268_v29 = vsel %vm267_vm1, 1, %v496_v41  ;;  %vm289_vm2 = vc.u32 %v287_v46, %v283_v45  ;;  %v291_v40 = vadd.s32 %v287_v46, %v283_v45  ;;  %v241_v58 = vsel %vm235_vm12, %v238_v37, %v240_v43 }
  0x3e   :  { %v150_v52 = vsub.s32 %v146_v22, %v149_v47  ;;  %v270_v55 = vadd.s32 %v268_v29, %v266_v48  ;;  %v290_v10 = vsel %vm289_vm2, 1, %v496_v41  ;;  %v295_v3 = vmul.u32 %v547_v34, %v241_v58 }
  0x3f   :  { %v292_v31 = vadd.s32 %v290_v10, %v288_v50  ;;  %v142_v41 = vadd.s32 %v609_v54, %v623_v59  ;;  %vm50_vm7 = vcmp.lt.s32.totalorder %v525_v0, 0  ;;  %vm671_vm8 = vcmp.le.f32.partialorder %v48_v2, 0.7853982 }
  0x40   :  { %vm151_vm3 = vcmp.lt.s32.totalorder %v150_v52, 0  ;;  %v152_v56 = vsub.s32 0, %v150_v52  ;;  %v271_v57 = vadd.s32 %v270_v55, %v260_v9  ;;  %v172_v37 = vsub.s32 4, %v650_v42 }
  0x41   :  { %v293_v61 = vadd.s32 %v292_v31, %v282_v49  ;;  %vm204_vm11 = vcmp.lt.s32.totalorder %v527_v1, 0  ;;  %vm689_vm13 = vcmp.le.f32.partialorder %v202_v5, 0.7853982  ;;  %vm191_vm15 = vweird.f32 %v525_v0 }
  0x42   :  { %v153_v62 = vsel %vm151_vm3, %v152_v56, %v150_v52  ;;  %v272_v20 = vadd.s32 %v271_v57, %v262_v53  ;;  %v173_v46 = vsel %vm50_vm7, %v172_v37, %v650_v42  ;;  %vm345_vm3 = vweird.f32 %v527_v1 }
  0x43   :  { %v154_v60 = vclz %v153_v62  ;;  %v294_v63 = vadd.s32 %v293_v61, %v284_v21  ;;  %v175_v50 = vsel %vm671_vm8, 0, %v173_v46 }
  0x44   :  { %vm297_vm4 = vc.u32 %v272_v20, %v291_v40  ;;  %v296_v45 = vadd.s32 %v291_v40, %v272_v20  ;;  %v192_v56 = vand.u32 3, %v175_v50 }
  0x45   :  { %v391_v4 = vadd.s32 4294967294, %v154_v60  ;;  %v298_v6 = vadd.s32 1, %v294_v63 }
  0x46   :  { %vm197_vm10 = vcmp.eq.s32.totalorder %v192_v56, 2  ;;  %vm194_vm12 = vcmp.eq.s32.totalorder %v192_v56, 0  ;;  %vm193_vm14 = vcmp.lt.s32.totalorder %v192_v56, 2 }
  0x47   :  { %vm392_vm5 = vcmp.lt.s32.totalorder %v391_v4, 0  ;;  %v299_v7 = vsel %vm297_vm4, %v298_v6, %v294_v63 }
  0x48   :  { %v157_v8 = vsel %vm392_vm5, 0, %v391_v4  ;;  %v300_v11 = vadd.s32 %v299_v7, %v295_v3 }
  0x49   :  { %v158_v12 = vsub.s32 32, %v157_v8  ;;  %v159_v51 = vshll.u32 %v150_v52, %v157_v8  ;;  %v162_v13 = vsub.s32 4294967266, %v157_v8 }
  0x4a   :  { %v301_v14 = vadd.s32 536870912, %v300_v11 }
  0x4b   :  { %v160_v15 = vshrl.u32 %v142_v41, %v158_v12  ;;  %v163_v17 = vadd.s32 127, %v162_v13  ;;  %v46_v41 = vld [vmem:[#allocation5] sm:$0xff] }
  0x4c   :  { %v665_v18 = vshrl.u32 %v301_v14, 30 }
  0x4d   :  { %v161_v19 = vor.u32 %v160_v15, %v159_v51  ;;  %v164_v34 = vshll.u32 %v163_v17, 23  ;;  %v362_v15 = vmul.f32 0.05, %v46_v41 }
  0x4e   :  { %v303_v16 = vshll.u32 %v665_v18, 30  ;;  %v326_v51 = vsub.s32 4, %v665_v18 }
  0x4f   :  { %v165_v22 = vor.u32 4788187, %v164_v34  ;;  %v168_v24 = vcvt.s32.f32 %v161_v19 }
  0x50   :  { %v304_v25 = vsub.s32 %v300_v11, %v303_v16 }
  0x51   :  { %v166_v54 = vand.u32 2147483647, %v165_v22 }
  0x52   :  { %vm305_vm6 = vcmp.lt.s32.totalorder %v304_v25, 0  ;;  %v306_v59 = vsub.s32 0, %v304_v25 }
  0x53   :  { %v169_v26 = vmul.f32 %v168_v24, %v166_v54  ;;  %v364_v54 = vmul.f32 %v362_v15, %v46_v41 }
  0x54   :  { %v307_v28 = vsel %vm305_vm6, %v306_v59, %v304_v25 }
  0x55   :  { %v170_v32 = vxor.u32 2147483648, %v169_v26  ;;  %v308_v35 = vclz %v307_v28 }
  0x57   :  { %v171_v36 = vsel %vm50_vm7, %v170_v32, %v169_v26  ;;  %v394_v27 = vadd.s32 4294967294, %v308_v35 }
  0x58   :  { %v174_v39 = vsel %vm671_vm8, %v525_v0, %v171_v36  ;;  %v327_v0 = vsel %vm204_vm11, %v326_v51, %v665_v18 }
  0x59   :  { %v176_v23 = vmul.f32 %v174_v39, %v174_v39  ;;  %vm395_vm9 = vcmp.lt.s32.totalorder %v394_v27, 0  ;;  %v329_v59 = vsel %vm689_vm13, 0, %v327_v0 }
  0x5a   :  { %v311_v33 = vsel %vm395_vm9, 0, %v394_v27  ;;  %v346_v27 = vand.u32 3, %v329_v59 }
  0x5b   :  { %v177_v2 = vmul.f32 -0.001358992, %v176_v23  ;;  %v184_v43 = vmul.f32 -0.00019511016, %v176_v23  ;;  %v312_v44 = vsub.s32 32, %v311_v33  ;;  %v313_v38 = vshll.u32 %v304_v25, %v311_v33 }
  0x5c   :  { %v316_v47 = vsub.s32 4294967266, %v311_v33  ;;  %vm351_vm0 = vcmp.eq.s32.totalorder %v346_v27, 2  ;;  %vm348_vm1 = vcmp.eq.s32.totalorder %v346_v27, 0  ;;  %vm347_vm2 = vcmp.lt.s32.totalorder %v346_v27, 2 }
  0x5d   :  { %v178_v9 = vadd.f32 0.041655596, %v177_v2  ;;  %v185_v48 = vadd.f32 0.008332121, %v184_v43  ;;  %v314_v29 = vshrl.u32 %v296_v45, %v312_v44  ;;  %v47_v2 = vld [vmem:[#allocation5 + $0x8] sm:$0xff] }
  0x5e   :  { %v317_v49 = vadd.s32 127, %v316_v47  ;;  %v363_v47 = vmul.f32 0.05, %v47_v2 }
  0x5f   :  { %v179_v52 = vmul.f32 %v178_v9, %v176_v23  ;;  %v186_v53 = vmul.f32 %v185_v48, %v176_v23  ;;  %v315_v55 = vor.u32 %v314_v29, %v313_v38 }
  0x60   :  { %v318_v10 = vshll.u32 %v317_v49, 23  ;;  %v365_v49 = vmul.f32 %v363_v47, %v47_v2 }
  0x61   :  { %v180_v21 = vadd.f32 -0.4999988, %v179_v52  ;;  %v187_v31 = vadd.f32 -0.16666654, %v186_v53  ;;  %v322_v40 = vcvt.s32.f32 %v315_v55 }
  0x62   :  { %v319_v57 = vor.u32 4788187, %v318_v10 }
  0x63   :  { %v181_v58 = vmul.f32 %v180_v21, %v176_v23  ;;  %v188_v61 = vmul.f32 %v187_v31, %v176_v23 }
  0x64   :  { %v320_v42 = vand.u32 2147483647, %v319_v57 }
  0x65   :  { %v182_v62 = vadd.f32 1.0, %v181_v58  ;;  %v189_v20 = vadd.f32 1.0, %v188_v61 }
  0x66   :  { %v323_v60 = vmul.f32 %v322_v40, %v320_v42 }
  0x67   :  { %v190_v63 = vmul.f32 %v189_v20, %v174_v39  ;;  %v198_v3 = vxor.u32 2147483648, %v182_v62 }
  0x68   :  { %v324_v6 = vxor.u32 2147483648, %v323_v60 }
  0x69   :  { %v195_v7 = vxor.u32 2147483648, %v190_v63  ;;  %v199_v8 = vsel %vm197_vm10, %v198_v3, %v190_v63 }
  0x6a   :  { %v325_v11 = vsel %vm204_vm11, %v324_v6, %v323_v60 }
  0x6b   :  { %v196_v12 = vsel %vm194_vm12, %v182_v62, %v195_v7  ;;  %v328_v5 = vsel %vm689_vm13, %v527_v1, %v325_v11 }
  0x6c   :  { %v200_v13 = vsel %vm193_vm14, %v196_v12, %v199_v8  ;;  %v330_v14 = vmul.f32 %v328_v5, %v328_v5 }
  0x6d   :  { %v201_v17 = vsel %vm191_vm15, nan, %v200_v13 }
  0x6e   :  { %v331_v19 = vmul.f32 -0.001358992, %v330_v14  ;;  %v338_v34 = vmul.f32 -0.00019511016, %v330_v14  ;;  %v356_v16 = vadd.f32 1.0, %v201_v17 }
  0x70   :  { %v332_v22 = vadd.f32 0.041655596, %v331_v19  ;;  %v339_v24 = vadd.f32 0.008332121, %v338_v34  ;;  %v358_v25 = vmul.f32 0.5, %v356_v16 }
  0x72   :  { %v333_v26 = vmul.f32 %v332_v22, %v330_v14  ;;  %v340_v28 = vmul.f32 %v339_v24, %v330_v14  ;;  %v360_v30 = vmul.f32 %v358_v25, %v356_v16 }
  0x74   :  { %v334_v32 = vadd.f32 -0.4999988, %v333_v26  ;;  %v341_v35 = vadd.f32 -0.16666654, %v340_v28  ;;  %v366_v36 = vadd.f32 %v364_v54, %v360_v30 }
  0x76   :  { %v335_v37 = vmul.f32 %v334_v32, %v330_v14  ;;  %v342_v39 = vmul.f32 %v341_v35, %v330_v14  ;;  %368 = vst [vmem:[#allocation7] sm:$0xff] %v366_v36 }
  0x78   :  { %v336_v23 = vadd.f32 1.0, %v335_v37  ;;  %v343_v45 = vadd.f32 1.0, %v342_v39 }
  0x7a   :  { %v344_v18 = vmul.f32 %v343_v45, %v328_v5  ;;  %v352_v33 = vxor.u32 2147483648, %v336_v23 }
  0x7c   :  { %v349_v43 = vxor.u32 2147483648, %v344_v18  ;;  %v353_v44 = vsel %vm351_vm0, %v352_v33, %v344_v18 }
  0x7e   :  { %v350_v38 = vsel %vm348_vm1, %v336_v23, %v349_v43 }
  0x7f   :  { %v354_v46 = vsel %vm347_vm2, %v350_v38, %v353_v44 }
  0x80   :  { %v355_v9 = vsel %vm345_vm3, nan, %v354_v46 }
  0x81   :  { %v357_v48 = vadd.f32 1.0, %v355_v9 }
  0x83   :  { %v359_v29 = vmul.f32 0.5, %v357_v48 }
  0x85   :  { %v361_v50 = vmul.f32 %v359_v29, %v357_v48 }
  0x87   :  { %v367_v52 = vadd.f32 %v365_v49, %v361_v50 }
  0x89   :  { %369 = vst [vmem:[#allocation7 + $0x8] sm:$0xff] %v367_v52 }
  0x8a   :  { %382 = dma.vmem_to_hbm [thread:$0]  %s375_s1, 256, %s377_s23, [#allocation4], %s487_s17, %s487_s17, %s488_s18  }
  0x8b   :  { %484 = dma.done.wait [#allocation4], 256  }
  0x8c   :  { %485 = vsyncadd [#allocation4], 4294967040 }
  0x8d   :  { %387 = vsyncpa [#allocation3], 1 }
  0x8e   :  { %388 = vsyncpa [#allocation6], 1 }
  0x8f   :  { %389 = vsyncpa [#allocation4], 1 }

</bundles_post_ra>
